<compile_context>
chip_gen: v7x
topology: tpu7x:2x2x1
jax: 0.10.0
libtpu: 0.0.40
codegen_flags: <defaults>
</compile_context>

<pallas_src>
import functools

import jax
import jax.numpy as jnp
from jax.experimental import pallas as pl
from jax.experimental.pallas import tpu as pltpu


# ----------------------------- recurrent Pallas kernel -----------------------------
def _lstm_rec_kernel(*refs, nd, tt, hidden, unroll, carry_state):
    """Serial LSTM recurrence, both directions interleaved.  Grid = (num_time_chunks,).

    refs layout:
      refs[0:nd]          gin per direction, block (tt, B, 4H) bf16
                          (direction 1's chunk is selected in reverse block order by its
                           index_map, so inside the chunk rows are walked tt-1 .. 0)
      refs[nd]            whh, block (nd, H, 4H) bf16, gate order (i, f, o, g)
      refs[nd+1:2*nd+1]   per-direction hidden outputs, block (tt, B, H) bf16
      refs[2*nd+1]        h scratch (nd, B, H) f32   (state persists across time chunks)
      refs[2*nd+2]        c scratch (nd, B, H) f32
    """
    gin_refs = refs[:nd]
    whh_ref = refs[nd]
    out_refs = refs[nd + 1:2 * nd + 1]
    h_scr = refs[2 * nd + 1]
    c_scr = refs[2 * nd + 2]

    t = pl.program_id(0)
    H = hidden

    @pl.when(t == 0)
    def _():
        h_scr[...] = jnp.zeros_like(h_scr)
        c_scr[...] = jnp.zeros_like(c_scr)

    # Loop-invariant recurrent weights (bf16 MXU operands).
    whh = [whh_ref[d] for d in range(nd)]

    def cell(d, row, h_prev, c_prev):
        # gates = gin[row] + h @ W_hh^T ; bf16 MXU operands, f32 accumulation,
        # element-wise gate math in f32 (v5e has no bf16 VALU/EUP).
        gates = gin_refs[d][row].astype(jnp.float32) + jnp.dot(
            h_prev.astype(jnp.bfloat16), whh[d],
            preferred_element_type=jnp.float32)                      # (B, 4H) f32
        # gate order (i, f, o, g): one contiguous sigmoid pass over the first 3H cols.
        sig = jax.nn.sigmoid(gates[:, 0:3 * H])
        i_g = sig[:, 0 * H:1 * H]
        f_g = sig[:, 1 * H:2 * H]
        o_g = sig[:, 2 * H:3 * H]
        g_g = jnp.tanh(gates[:, 3 * H:4 * H])
        c_new = f_g * c_prev + i_g * g_g
        h_new = o_g * jnp.tanh(c_new)
        out_refs[d][row] = h_new.astype(out_refs[d].dtype)
        return h_new, c_new

    def step(i, carry):
        if carry_state:
            hs, cs = carry
            hs, cs = list(hs), list(cs)
        else:
            hs = [h_scr[d] for d in range(nd)]
            cs = [c_scr[d] for d in range(nd)]
        for d in range(nd):
            row = i if d == 0 else tt - 1 - i    # fwd walks 0..tt-1, bwd walks tt-1..0
            hs[d], cs[d] = cell(d, row, hs[d], cs[d])
        if carry_state:
            return tuple(hs), tuple(cs)
        for d in range(nd):
            h_scr[d] = hs[d]
            c_scr[d] = cs[d]
        return carry

    if carry_state:
        # Keep (h, c) in vregs across the whole chunk; write scratch once at the end.
        init = (tuple(h_scr[d] for d in range(nd)),
                tuple(c_scr[d] for d in range(nd)))
        hs, cs = jax.lax.fori_loop(0, tt, step, init, unroll=unroll)
        for d in range(nd):
            h_scr[d] = hs[d]
            c_scr[d] = cs[d]
    else:
        jax.lax.fori_loop(0, tt, step, 0, unroll=unroll)


def _lstm_recurrence(gin, whh_t, *, hidden, time_chunk):
    """gin: (nd, Tp, B, 4H) bf16; whh_t: (nd, H, 4H) bf16 -> list of nd bf16 (Tp, B, H)."""
    nd, tp, b, _ = gin.shape
    nt = tp // time_chunk

    def gin_map(d):
        if d == 0:
            return lambda t: (0, t, 0, 0)
        return lambda t: (d, nt - 1 - t, 0, 0)       # backward: reverse time-block order

    def out_map(d):
        if d == 0:
            return lambda t: (t, 0, 0)
        return lambda t: (nt - 1 - t, 0, 0)

    # Keep (h, c) in vregs across the chunk when each (B, H) f32 state fits ~<=24 vregs.
    carry_state = (b * hidden * 4) <= 24 * 4096
    unroll = time_chunk if time_chunk <= 8 else 8    # partial unroll for long chunks

    kernel = functools.partial(_lstm_rec_kernel, nd=nd, tt=time_chunk,
                               hidden=hidden, unroll=unroll, carry_state=carry_state)

    # Explicit scoped-VMEM budget sized from the actual blocks (double-buffered inputs
    # and outputs + whh + scratch), capped to stay within v7x's 64 MiB physical VMEM.
    gin_blk = time_chunk * b * 4 * hidden * 2        # bf16
    out_blk = time_chunk * b * hidden * 2            # bf16
    whh_bytes = nd * hidden * 4 * hidden * 2         # bf16
    scr_bytes = 2 * nd * b * hidden * 4              # f32
    needed = nd * 2 * (gin_blk + out_blk) + 2 * whh_bytes + scr_bytes
    vmem_limit = int(min(max(2 * needed, 32 * 1024 * 1024), 56 * 1024 * 1024))

    outs = pl.pallas_call(
        kernel,
        out_shape=[jax.ShapeDtypeStruct((tp, b, hidden), jnp.bfloat16) for _ in range(nd)],
        grid_spec=pltpu.PrefetchScalarGridSpec(
            num_scalar_prefetch=0,
            grid=(nt,),
            in_specs=(
                [pl.BlockSpec((None, time_chunk, b, 4 * hidden), gin_map(d))
                 for d in range(nd)]
                + [pl.BlockSpec((nd, hidden, 4 * hidden), lambda t: (0, 0, 0))]
            ),
            out_specs=[pl.BlockSpec((time_chunk, b, hidden), out_map(d)) for d in range(nd)],
            scratch_shapes=[
                pltpu.VMEM((nd, b, hidden), jnp.float32),   # h state per direction
                pltpu.VMEM((nd, b, hidden), jnp.float32),   # c state per direction
            ],
        ),
        compiler_params=pltpu.CompilerParams(
            dimension_semantics=("arbitrary",),
            vmem_limit_bytes=vmem_limit,
        ),
    )(*([gin] * nd + [whh_t]))
    return list(outs)


# ----------------------------------- wrapper ---------------------------------------
def _permute_gates(w, H):
    """Reorder gate blocks along the last axis from PyTorch (i, f, g, o) to (i, f, o, g)."""
    return jnp.concatenate(
        [w[..., 0 * H:1 * H], w[..., 1 * H:2 * H], w[..., 3 * H:4 * H], w[..., 2 * H:3 * H]],
        axis=-1)


def lstm_encoder_forward(inputs, input_lengths, params, *, time_chunk=16):
    """inputs: (B, T, input_dim), batch_first.  Returns (outputs, input_lengths) with
    outputs: (B, T, hidden * num_dirs), matching LSTMEncoder.forward (no packing;
    lengths pass straight through)."""
    # TODO(synk): nn.LSTM inter-layer dropout (p=0.1) is train-mode only; this is eval-mode.
    B, T, _ = inputs.shape
    x = jnp.transpose(inputs, (1, 0, 2)).astype(jnp.float32)          # (T, B, D) time-major

    tt = max(1, min(time_chunk, T))
    tp = pl.cdiv(T, tt) * tt
    pad = tp - T
    if pad:
        x = jnp.pad(x, ((0, pad), (0, 0), (0, 0)))                    # pad the input ONCE
        # Pad rows of every layer's gin must be EXACTLY zero so the backward sweep (which
        # hits padding first) keeps its (h, c) state at zero until the real data starts.
        mask = (jnp.arange(tp) < T).astype(jnp.float32)[None, :, None, None]

    x_bf = x.astype(jnp.bfloat16)
    h_list = None                                                     # per-dir bf16 (Tp,B,H)
    for layer_idx, dirs in enumerate(params):
        nd = len(dirs)
        H = dirs[0][1].shape[1]                                       # w_hh: (4H, H)
        wih_t = jnp.stack([_permute_gates(w_ih.T, H) for (w_ih, _, _, _) in dirs]
                          ).astype(jnp.bfloat16)                      # (nd, Din, 4H)
        whh_t = jnp.stack([_permute_gates(w_hh.T, H) for (_, w_hh, _, _) in dirs]
                          ).astype(jnp.bfloat16)                      # (nd, H, 4H)
        bias = jnp.stack([_permute_gates(b_ih + b_hh, H)
                          for (_, _, b_ih, b_hh) in dirs])            # (nd, 4H) f32

        # Input projection as one big bf16 GEMM per layer (hoisted off the serial path).
        if layer_idx == 0:
            gin = jnp.einsum('tbd,gdk->gtbk', x_bf, wih_t,
                             preferred_element_type=jnp.float32)
        else:
            nd_in = len(h_list)
            h_in = h_list[0].shape[-1]
            w4 = wih_t.reshape(nd, nd_in, h_in, 4 * H)                # rows: fwd block, bwd block
            gin = sum(jnp.einsum('tbh,ghk->gtbk', h_list[i], w4[:, i],
                                 preferred_element_type=jnp.float32)
                      for i in range(nd_in))
        gin = gin + bias[:, None, None, :]                            # (nd, Tp, B, 4H) f32
        if pad:
            gin = gin * mask                                          # exact zeros at pad rows
        gin = gin.astype(jnp.bfloat16)

        h_list = _lstm_recurrence(gin, whh_t, hidden=H, time_chunk=tt)

    h_full = jnp.concatenate(h_list, axis=-1)                         # (Tp, B, nd*H) bf16
    outputs = jnp.transpose(h_full[:T], (1, 0, 2)).astype(inputs.dtype)   # (B, T, nd*H)
    return outputs, input_lengths


def init_lstm_params(key, input_dim, hidden_size, num_layers, bidirectional=True):
    """Deterministic param init mirroring nn.LSTM shapes (uniform(-1/sqrt(H), 1/sqrt(H)))."""
    num_dirs = 2 if bidirectional else 1
    bound = 1.0 / jnp.sqrt(hidden_size)
    params = []
    for layer in range(num_layers):
        d_in = input_dim if layer == 0 else hidden_size * num_dirs
        dirs = []
        for _ in range(num_dirs):
            key, k1, k2, k3, k4 = jax.random.split(key, 5)
            w_ih = jax.random.uniform(k1, (4 * hidden_size, d_in), jnp.float32, -bound, bound)
            w_hh = jax.random.uniform(k2, (4 * hidden_size, hidden_size), jnp.float32, -bound, bound)
            b_ih = jax.random.uniform(k3, (4 * hidden_size,), jnp.float32, -bound, bound)
            b_hh = jax.random.uniform(k4, (4 * hidden_size,), jnp.float32, -bound, bound)
            dirs.append((w_ih, w_hh, b_ih, b_hh))
        params.append(dirs)
    return params


# ------------------------------- pure-JAX reference --------------------------------
def _ref_layer_direction(x_tbd, w_ih, w_hh, b_ih, b_hh):
    T, B, _ = x_tbd.shape
    H = w_hh.shape[1]
    bias = (b_ih + b_hh)[None, :]

    def step(carry, x_t):
        h, c = carry
        gates = x_t @ w_ih.T + h @ w_hh.T + bias
        i = jax.nn.sigmoid(gates[:, 0 * H:1 * H])
        f = jax.nn.sigmoid(gates[:, 1 * H:2 * H])
        g = jnp.tanh(gates[:, 2 * H:3 * H])
        o = jax.nn.sigmoid(gates[:, 3 * H:4 * H])
        c = f * c + i * g
        h = o * jnp.tanh(c)
        return (h, c), h

    init = (jnp.zeros((B, H), jnp.float32), jnp.zeros((B, H), jnp.float32))
    _, hs = jax.lax.scan(step, init, x_tbd)
    return hs


def _ref_forward(inputs, params):
    x = jnp.transpose(inputs, (1, 0, 2)).astype(jnp.float32)
    for dirs in params:
        outs = []
        for d, (w_ih, w_hh, b_ih, b_hh) in enumerate(dirs):
            if d == 1:
                h = jnp.flip(_ref_layer_direction(jnp.flip(x, 0), w_ih, w_hh, b_ih, b_hh), 0)
            else:
                h = _ref_layer_direction(x, w_ih, w_hh, b_ih, b_hh)
            outs.append(h)
        x = jnp.concatenate(outs, axis=-1)
    return jnp.transpose(x, (1, 0, 2))


if __name__ == "__main__":
    # Small shapes; T=10 with time_chunk=4 exercises multi-chunk serialization AND the
    # padded-tail path (tp=12) that the backward direction's zero-state trick relies on.
    B, T, input_dim, hidden_size, num_layers = 2, 10, 16, 32, 2

    key = jax.random.PRNGKey(0)
    k_x, k_p = jax.random.split(key)
    inputs = jax.random.normal(k_x, (B, T, input_dim), jnp.float32)
    input_lengths = jnp.array([T, T - 3], dtype=jnp.int32)

    params = init_lstm_params(k_p, input_dim, hidden_size, num_layers, bidirectional=True)

    fwd = jax.jit(lambda i, l, p: lstm_encoder_forward(i, l, p, time_chunk=4))
    outputs, out_lens = fwd(inputs, input_lengths, params)
    outputs = jax.block_until_ready(outputs)
    out_lens = jax.block_until_ready(out_lens)

    assert outputs.shape == (B, T, 2 * hidden_size), outputs.shape
    assert out_lens.shape == (B,)

    ref = jax.block_until_ready(_ref_forward(inputs, params))
    err = float(jnp.max(jnp.abs(outputs - ref)))
    # bf16 weights/activations vs the f32 reference -> loosened tolerance.
    assert err < 8e-2, f"max abs error {err} vs pure-JAX f32 reference"

    print("KERNEL_OK")
</pallas_src>

<mosaic_0001>
module attributes {stable_mosaic.version = 11 : i64} {
  func.func @_lstm_rec_kernel(%arg0: i32, %arg1: memref<1x4x2x128xbf16, #tpu.memory_space<vmem>>, %arg2: memref<1x4x2x128xbf16, #tpu.memory_space<vmem>>, %arg3: memref<2x32x128xbf16, #tpu.memory_space<vmem>>, %arg4: memref<4x2x32xbf16, #tpu.memory_space<vmem>>, %arg5: memref<4x2x32xbf16, #tpu.memory_space<vmem>>, %arg6: memref<2x2x32xf32, #tpu.memory_space<vmem>>, %arg7: memref<2x2x32xf32, #tpu.memory_space<vmem>>) attributes {dimension_semantics = [#tpu.dimension_semantics<arbitrary>], iteration_bounds = array<i64: 3>, scalar_prefetch = 0 : i64, scratch_operands = 2 : i64, tpu.core_type = #tpu.core_type<tc>, window_params = [{transform_indices = @transform_0, window_bounds = array<i64: 1, 4, 2, 128>}, {transform_indices = @transform_1, window_bounds = array<i64: 1, 4, 2, 128>}, {pipeline_mode = #tpu.pipeline_mode<synchronous>, transform_indices = @transform_2, window_bounds = array<i64: 2, 32, 128>}, {transform_indices = @transform_3, window_bounds = array<i64: 4, 2, 32>}, {transform_indices = @transform_4, window_bounds = array<i64: 4, 2, 32>}]} {
    %c0_i32 = arith.constant 0 : i32
    %0 = arith.cmpi eq, %arg0, %c0_i32 : i32
    %1 = arith.extui %0 : i1 to i32
    %c0_i32_0 = arith.constant 0 : i32
    %2 = arith.cmpi ne, %1, %c0_i32_0 : i32
    scf.if %2 {
      %cst_89 = arith.constant 0.000000e+00 : f32
      %255 = vector.broadcast %cst_89 : f32 to vector<2x2x32xf32>
      %c0_90 = arith.constant 0 : index
      %c0_91 = arith.constant 0 : index
      %c0_92 = arith.constant 0 : index
      %256 = vector.load %arg6[%c0_90, %c0_91, %c0_92] : memref<2x2x32xf32, #tpu.memory_space<vmem>>, vector<2x2x32xf32>
      tpu.vector_store %arg6[%c0_90, %c0_91, %c0_92], %255 {strides = array<i32>} : memref<2x2x32xf32, #tpu.memory_space<vmem>>, vector<2x2x32xf32>,
      %cst_93 = arith.constant 0.000000e+00 : f32
      %257 = vector.broadcast %cst_93 : f32 to vector<2x2x32xf32>
      %c0_94 = arith.constant 0 : index
      %c0_95 = arith.constant 0 : index
      %c0_96 = arith.constant 0 : index
      %258 = vector.load %arg7[%c0_94, %c0_95, %c0_96] : memref<2x2x32xf32, #tpu.memory_space<vmem>>, vector<2x2x32xf32>
      tpu.vector_store %arg7[%c0_94, %c0_95, %c0_96], %257 {strides = array<i32>} : memref<2x2x32xf32, #tpu.memory_space<vmem>>, vector<2x2x32xf32>,
    } else {
    }
    %c0 = arith.constant 0 : index
    %c0_1 = arith.constant 0 : index
    %c0_2 = arith.constant 0 : index
    %3 = vector.load %arg3[%c0, %c0_1, %c0_2] : memref<2x32x128xbf16, #tpu.memory_space<vmem>>, vector<1x32x128xbf16>
    %4 = vector.shape_cast %3 : vector<1x32x128xbf16> to vector<32x128xbf16>
    %c1 = arith.constant 1 : index
    %c0_3 = arith.constant 0 : index
    %c0_4 = arith.constant 0 : index
    %5 = vector.load %arg3[%c1, %c0_3, %c0_4] : memref<2x32x128xbf16, #tpu.memory_space<vmem>>, vector<1x32x128xbf16>
    %6 = vector.shape_cast %5 : vector<1x32x128xbf16> to vector<32x128xbf16>
    %c0_5 = arith.constant 0 : index
    %c0_6 = arith.constant 0 : index
    %c0_7 = arith.constant 0 : index
    %7 = vector.load %arg6[%c0_5, %c0_6, %c0_7] : memref<2x2x32xf32, #tpu.memory_space<vmem>>, vector<1x2x32xf32>
    %8 = vector.shape_cast %7 : vector<1x2x32xf32> to vector<2x32xf32>
    %c1_8 = arith.constant 1 : index
    %c0_9 = arith.constant 0 : index
    %c0_10 = arith.constant 0 : index
    %9 = vector.load %arg6[%c1_8, %c0_9, %c0_10] : memref<2x2x32xf32, #tpu.memory_space<vmem>>, vector<1x2x32xf32>
    %10 = vector.shape_cast %9 : vector<1x2x32xf32> to vector<2x32xf32>
    %c0_11 = arith.constant 0 : index
    %c0_12 = arith.constant 0 : index
    %c0_13 = arith.constant 0 : index
    %11 = vector.load %arg7[%c0_11, %c0_12, %c0_13] : memref<2x2x32xf32, #tpu.memory_space<vmem>>, vector<1x2x32xf32>
    %12 = vector.shape_cast %11 : vector<1x2x32xf32> to vector<2x32xf32>
    %c1_14 = arith.constant 1 : index
    %c0_15 = arith.constant 0 : index
    %c0_16 = arith.constant 0 : index
    %13 = vector.load %arg7[%c1_14, %c0_15, %c0_16] : memref<2x2x32xf32, #tpu.memory_space<vmem>>, vector<1x2x32xf32>
    %14 = vector.shape_cast %13 : vector<1x2x32xf32> to vector<2x32xf32>
    %c0_i32_17 = arith.constant 0 : i32
    %c0_18 = arith.constant 0 : index
    %15 = arith.index_cast %c0_i32_17 : i32 to index
    %c0_19 = arith.constant 0 : index
    %c0_20 = arith.constant 0 : index
    %16 = vector.load %arg1[%c0_18, %15, %c0_19, %c0_20] : memref<1x4x2x128xbf16, #tpu.memory_space<vmem>>, vector<1x1x2x128xbf16>
    %17 = vector.shape_cast %16 : vector<1x1x2x128xbf16> to vector<2x128xbf16>
    %18 = arith.extf %17 : vector<2x128xbf16> to vector<2x128xf32>
    %19 = arith.truncf %8 : vector<2x32xf32> to vector<2x32xbf16>
    %cst = arith.constant dense<0.000000e+00> : vector<2x128xf32>
    %20 = tpu.matmul %19, %4, %cst {dimension_numbers = #tpu.dot_dimension_numbers<[1], [0], [0], [1], [0, 0, 1, 1], [], []>} : vector<2x32xbf16>, vector<32x128xbf16>, vector<2x128xf32> -> vector<2x128xf32>
    %21 = arith.addf %18, %20 : vector<2x128xf32>
    %22 = vector.extract_strided_slice %21 {offsets = [0, 0], sizes = [2, 96], strides = [1, 1]} : vector<2x128xf32> to vector<2x96xf32>
    %23 = arith.negf %22 : vector<2x96xf32>
    %24 = math.exp %23 : vector<2x96xf32>
    %cst_21 = arith.constant 1.000000e+00 : f32
    %25 = vector.broadcast %cst_21 : f32 to vector<2x96xf32>
    %26 = arith.addf %25, %24 : vector<2x96xf32>
    %27 = arith.divf %25, %26 : vector<2x96xf32>
    %28 = vector.extract_strided_slice %27 {offsets = [0, 0], sizes = [2, 32], strides = [1, 1]} : vector<2x96xf32> to vector<2x32xf32>
    %29 = vector.extract_strided_slice %27 {offsets = [0, 32], sizes = [2, 32], strides = [1, 1]} : vector<2x96xf32> to vector<2x32xf32>
    %30 = vector.extract_strided_slice %27 {offsets = [0, 64], sizes = [2, 32], strides = [1, 1]} : vector<2x96xf32> to vector<2x32xf32>
    %31 = vector.extract_strided_slice %21 {offsets = [0, 96], sizes = [2, 32], strides = [1, 1]} : vector<2x128xf32> to vector<2x32xf32>
    %32 = math.tanh %31 : vector<2x32xf32>
    %33 = arith.mulf %29, %12 : vector<2x32xf32>
    %34 = arith.mulf %28, %32 : vector<2x32xf32>
    %35 = arith.addf %33, %34 : vector<2x32xf32>
    %36 = math.tanh %35 : vector<2x32xf32>
    %37 = arith.mulf %30, %36 : vector<2x32xf32>
    %38 = arith.truncf %37 : vector<2x32xf32> to vector<2x32xbf16>
    %39 = arith.index_cast %c0_i32_17 : i32 to index
    %c0_22 = arith.constant 0 : index
    %c0_23 = arith.constant 0 : index
    %40 = vector.load %arg4[%39, %c0_22, %c0_23] : memref<4x2x32xbf16, #tpu.memory_space<vmem>>, vector<1x2x32xbf16>
    %41 = vector.shape_cast %40 : vector<1x2x32xbf16> to vector<2x32xbf16>
    %42 = vector.shape_cast %38 : vector<2x32xbf16> to vector<1x2x32xbf16>
    tpu.vector_store %arg4[%39, %c0_22, %c0_23], %42 {strides = array<i32>} : memref<4x2x32xbf16, #tpu.memory_space<vmem>>, vector<1x2x32xbf16>,
    %c3_i32 = arith.constant 3 : i32
    %43 = arith.subi %c3_i32, %c0_i32_17 : i32
    %c0_24 = arith.constant 0 : index
    %44 = arith.index_cast %43 : i32 to index
    %c0_25 = arith.constant 0 : index
    %c0_26 = arith.constant 0 : index
    %45 = vector.load %arg2[%c0_24, %44, %c0_25, %c0_26] : memref<1x4x2x128xbf16, #tpu.memory_space<vmem>>, vector<1x1x2x128xbf16>
    %46 = vector.shape_cast %45 : vector<1x1x2x128xbf16> to vector<2x128xbf16>
    %47 = arith.extf %46 : vector<2x128xbf16> to vector<2x128xf32>
    %48 = arith.truncf %10 : vector<2x32xf32> to vector<2x32xbf16>
    %cst_27 = arith.constant dense<0.000000e+00> : vector<2x128xf32>
    %49 = tpu.matmul %48, %6, %cst_27 {dimension_numbers = #tpu.dot_dimension_numbers<[1], [0], [0], [1], [0, 0, 1, 1], [], []>} : vector<2x32xbf16>, vector<32x128xbf16>, vector<2x128xf32> -> vector<2x128xf32>
    %50 = arith.addf %47, %49 : vector<2x128xf32>
    %51 = vector.extract_strided_slice %50 {offsets = [0, 0], sizes = [2, 96], strides = [1, 1]} : vector<2x128xf32> to vector<2x96xf32>
    %52 = arith.negf %51 : vector<2x96xf32>
    %53 = math.exp %52 : vector<2x96xf32>
    %cst_28 = arith.constant 1.000000e+00 : f32
    %54 = vector.broadcast %cst_28 : f32 to vector<2x96xf32>
    %55 = arith.addf %54, %53 : vector<2x96xf32>
    %56 = arith.divf %54, %55 : vector<2x96xf32>
    %57 = vector.extract_strided_slice %56 {offsets = [0, 0], sizes = [2, 32], strides = [1, 1]} : vector<2x96xf32> to vector<2x32xf32>
    %58 = vector.extract_strided_slice %56 {offsets = [0, 32], sizes = [2, 32], strides = [1, 1]} : vector<2x96xf32> to vector<2x32xf32>
    %59 = vector.extract_strided_slice %56 {offsets = [0, 64], sizes = [2, 32], strides = [1, 1]} : vector<2x96xf32> to vector<2x32xf32>
    %60 = vector.extract_strided_slice %50 {offsets = [0, 96], sizes = [2, 32], strides = [1, 1]} : vector<2x128xf32> to vector<2x32xf32>
    %61 = math.tanh %60 : vector<2x32xf32>
    %62 = arith.mulf %58, %14 : vector<2x32xf32>
    %63 = arith.mulf %57, %61 : vector<2x32xf32>
    %64 = arith.addf %62, %63 : vector<2x32xf32>
    %65 = math.tanh %64 : vector<2x32xf32>
    %66 = arith.mulf %59, %65 : vector<2x32xf32>
    %67 = arith.truncf %66 : vector<2x32xf32> to vector<2x32xbf16>
    %68 = arith.index_cast %43 : i32 to index
    %c0_29 = arith.constant 0 : index
    %c0_30 = arith.constant 0 : index
    %69 = vector.load %arg5[%68, %c0_29, %c0_30] : memref<4x2x32xbf16, #tpu.memory_space<vmem>>, vector<1x2x32xbf16>
    %70 = vector.shape_cast %69 : vector<1x2x32xbf16> to vector<2x32xbf16>
    %71 = vector.shape_cast %67 : vector<2x32xbf16> to vector<1x2x32xbf16>
    tpu.vector_store %arg5[%68, %c0_29, %c0_30], %71 {strides = array<i32>} : memref<4x2x32xbf16, #tpu.memory_space<vmem>>, vector<1x2x32xbf16>,
    %c1_i32 = arith.constant 1 : i32
    %c0_31 = arith.constant 0 : index
    %72 = arith.index_cast %c1_i32 : i32 to index
    %c0_32 = arith.constant 0 : index
    %c0_33 = arith.constant 0 : index
    %73 = vector.load %arg1[%c0_31, %72, %c0_32, %c0_33] : memref<1x4x2x128xbf16, #tpu.memory_space<vmem>>, vector<1x1x2x128xbf16>
    %74 = vector.shape_cast %73 : vector<1x1x2x128xbf16> to vector<2x128xbf16>
    %75 = arith.extf %74 : vector<2x128xbf16> to vector<2x128xf32>
    %76 = arith.truncf %37 : vector<2x32xf32> to vector<2x32xbf16>
    %cst_34 = arith.constant dense<0.000000e+00> : vector<2x128xf32>
    %77 = tpu.matmul %76, %4, %cst_34 {dimension_numbers = #tpu.dot_dimension_numbers<[1], [0], [0], [1], [0, 0, 1, 1], [], []>} : vector<2x32xbf16>, vector<32x128xbf16>, vector<2x128xf32> -> vector<2x128xf32>
    %78 = arith.addf %75, %77 : vector<2x128xf32>
    %79 = vector.extract_strided_slice %78 {offsets = [0, 0], sizes = [2, 96], strides = [1, 1]} : vector<2x128xf32> to vector<2x96xf32>
    %80 = arith.negf %79 : vector<2x96xf32>
    %81 = math.exp %80 : vector<2x96xf32>
    %cst_35 = arith.constant 1.000000e+00 : f32
    %82 = vector.broadcast %cst_35 : f32 to vector<2x96xf32>
    %83 = arith.addf %82, %81 : vector<2x96xf32>
    %84 = arith.divf %82, %83 : vector<2x96xf32>
    %85 = vector.extract_strided_slice %84 {offsets = [0, 0], sizes = [2, 32], strides = [1, 1]} : vector<2x96xf32> to vector<2x32xf32>
    %86 = vector.extract_strided_slice %84 {offsets = [0, 32], sizes = [2, 32], strides = [1, 1]} : vector<2x96xf32> to vector<2x32xf32>
    %87 = vector.extract_strided_slice %84 {offsets = [0, 64], sizes = [2, 32], strides = [1, 1]} : vector<2x96xf32> to vector<2x32xf32>
    %88 = vector.extract_strided_slice %78 {offsets = [0, 96], sizes = [2, 32], strides = [1, 1]} : vector<2x128xf32> to vector<2x32xf32>
    %89 = math.tanh %88 : vector<2x32xf32>
    %90 = arith.mulf %86, %35 : vector<2x32xf32>
    %91 = arith.mulf %85, %89 : vector<2x32xf32>
    %92 = arith.addf %90, %91 : vector<2x32xf32>
    %93 = math.tanh %92 : vector<2x32xf32>
    %94 = arith.mulf %87, %93 : vector<2x32xf32>
    %95 = arith.truncf %94 : vector<2x32xf32> to vector<2x32xbf16>
    %96 = arith.index_cast %c1_i32 : i32 to index
    %c0_36 = arith.constant 0 : index
    %c0_37 = arith.constant 0 : index
    %97 = vector.load %arg4[%96, %c0_36, %c0_37] : memref<4x2x32xbf16, #tpu.memory_space<vmem>>, vector<1x2x32xbf16>
    %98 = vector.shape_cast %97 : vector<1x2x32xbf16> to vector<2x32xbf16>
    %99 = vector.shape_cast %95 : vector<2x32xbf16> to vector<1x2x32xbf16>
    tpu.vector_store %arg4[%96, %c0_36, %c0_37], %99 {strides = array<i32>} : memref<4x2x32xbf16, #tpu.memory_space<vmem>>, vector<1x2x32xbf16>,
    %c3_i32_38 = arith.constant 3 : i32
    %100 = arith.subi %c3_i32_38, %c1_i32 : i32
    %c0_39 = arith.constant 0 : index
    %101 = arith.index_cast %100 : i32 to index
    %c0_40 = arith.constant 0 : index
    %c0_41 = arith.constant 0 : index
    %102 = vector.load %arg2[%c0_39, %101, %c0_40, %c0_41] : memref<1x4x2x128xbf16, #tpu.memory_space<vmem>>, vector<1x1x2x128xbf16>
    %103 = vector.shape_cast %102 : vector<1x1x2x128xbf16> to vector<2x128xbf16>
    %104 = arith.extf %103 : vector<2x128xbf16> to vector<2x128xf32>
    %105 = arith.truncf %66 : vector<2x32xf32> to vector<2x32xbf16>
    %cst_42 = arith.constant dense<0.000000e+00> : vector<2x128xf32>
    %106 = tpu.matmul %105, %6, %cst_42 {dimension_numbers = #tpu.dot_dimension_numbers<[1], [0], [0], [1], [0, 0, 1, 1], [], []>} : vector<2x32xbf16>, vector<32x128xbf16>, vector<2x128xf32> -> vector<2x128xf32>
    %107 = arith.addf %104, %106 : vector<2x128xf32>
    %108 = vector.extract_strided_slice %107 {offsets = [0, 0], sizes = [2, 96], strides = [1, 1]} : vector<2x128xf32> to vector<2x96xf32>
    %109 = arith.negf %108 : vector<2x96xf32>
    %110 = math.exp %109 : vector<2x96xf32>
    %cst_43 = arith.constant 1.000000e+00 : f32
    %111 = vector.broadcast %cst_43 : f32 to vector<2x96xf32>
    %112 = arith.addf %111, %110 : vector<2x96xf32>
    %113 = arith.divf %111, %112 : vector<2x96xf32>
    %114 = vector.extract_strided_slice %113 {offsets = [0, 0], sizes = [2, 32], strides = [1, 1]} : vector<2x96xf32> to vector<2x32xf32>
    %115 = vector.extract_strided_slice %113 {offsets = [0, 32], sizes = [2, 32], strides = [1, 1]} : vector<2x96xf32> to vector<2x32xf32>
    %116 = vector.extract_strided_slice %113 {offsets = [0, 64], sizes = [2, 32], strides = [1, 1]} : vector<2x96xf32> to vector<2x32xf32>
    %117 = vector.extract_strided_slice %107 {offsets = [0, 96], sizes = [2, 32], strides = [1, 1]} : vector<2x128xf32> to vector<2x32xf32>
    %118 = math.tanh %117 : vector<2x32xf32>
    %119 = arith.mulf %115, %64 : vector<2x32xf32>
    %120 = arith.mulf %114, %118 : vector<2x32xf32>
    %121 = arith.addf %119, %120 : vector<2x32xf32>
    %122 = math.tanh %121 : vector<2x32xf32>
    %123 = arith.mulf %116, %122 : vector<2x32xf32>
    %124 = arith.truncf %123 : vector<2x32xf32> to vector<2x32xbf16>
    %125 = arith.index_cast %100 : i32 to index
    %c0_44 = arith.constant 0 : index
    %c0_45 = arith.constant 0 : index
    %126 = vector.load %arg5[%125, %c0_44, %c0_45] : memref<4x2x32xbf16, #tpu.memory_space<vmem>>, vector<1x2x32xbf16>
    %127 = vector.shape_cast %126 : vector<1x2x32xbf16> to vector<2x32xbf16>
    %128 = vector.shape_cast %124 : vector<2x32xbf16> to vector<1x2x32xbf16>
    tpu.vector_store %arg5[%125, %c0_44, %c0_45], %128 {strides = array<i32>} : memref<4x2x32xbf16, #tpu.memory_space<vmem>>, vector<1x2x32xbf16>,
    %c2_i32 = arith.constant 2 : i32
    %c0_46 = arith.constant 0 : index
    %129 = arith.index_cast %c2_i32 : i32 to index
    %c0_47 = arith.constant 0 : index
    %c0_48 = arith.constant 0 : index
    %130 = vector.load %arg1[%c0_46, %129, %c0_47, %c0_48] : memref<1x4x2x128xbf16, #tpu.memory_space<vmem>>, vector<1x1x2x128xbf16>
    %131 = vector.shape_cast %130 : vector<1x1x2x128xbf16> to vector<2x128xbf16>
    %132 = arith.extf %131 : vector<2x128xbf16> to vector<2x128xf32>
    %133 = arith.truncf %94 : vector<2x32xf32> to vector<2x32xbf16>
    %cst_49 = arith.constant dense<0.000000e+00> : vector<2x128xf32>
    %134 = tpu.matmul %133, %4, %cst_49 {dimension_numbers = #tpu.dot_dimension_numbers<[1], [0], [0], [1], [0, 0, 1, 1], [], []>} : vector<2x32xbf16>, vector<32x128xbf16>, vector<2x128xf32> -> vector<2x128xf32>
    %135 = arith.addf %132, %134 : vector<2x128xf32>
    %136 = vector.extract_strided_slice %135 {offsets = [0, 0], sizes = [2, 96], strides = [1, 1]} : vector<2x128xf32> to vector<2x96xf32>
    %137 = arith.negf %136 : vector<2x96xf32>
    %138 = math.exp %137 : vector<2x96xf32>
    %cst_50 = arith.constant 1.000000e+00 : f32
    %139 = vector.broadcast %cst_50 : f32 to vector<2x96xf32>
    %140 = arith.addf %139, %138 : vector<2x96xf32>
    %141 = arith.divf %139, %140 : vector<2x96xf32>
    %142 = vector.extract_strided_slice %141 {offsets = [0, 0], sizes = [2, 32], strides = [1, 1]} : vector<2x96xf32> to vector<2x32xf32>
    %143 = vector.extract_strided_slice %141 {offsets = [0, 32], sizes = [2, 32], strides = [1, 1]} : vector<2x96xf32> to vector<2x32xf32>
    %144 = vector.extract_strided_slice %141 {offsets = [0, 64], sizes = [2, 32], strides = [1, 1]} : vector<2x96xf32> to vector<2x32xf32>
    %145 = vector.extract_strided_slice %135 {offsets = [0, 96], sizes = [2, 32], strides = [1, 1]} : vector<2x128xf32> to vector<2x32xf32>
    %146 = math.tanh %145 : vector<2x32xf32>
    %147 = arith.mulf %143, %92 : vector<2x32xf32>
    %148 = arith.mulf %142, %146 : vector<2x32xf32>
    %149 = arith.addf %147, %148 : vector<2x32xf32>
    %150 = math.tanh %149 : vector<2x32xf32>
    %151 = arith.mulf %144, %150 : vector<2x32xf32>
    %152 = arith.truncf %151 : vector<2x32xf32> to vector<2x32xbf16>
    %153 = arith.index_cast %c2_i32 : i32 to index
    %c0_51 = arith.constant 0 : index
    %c0_52 = arith.constant 0 : index
    %154 = vector.load %arg4[%153, %c0_51, %c0_52] : memref<4x2x32xbf16, #tpu.memory_space<vmem>>, vector<1x2x32xbf16>
    %155 = vector.shape_cast %154 : vector<1x2x32xbf16> to vector<2x32xbf16>
    %156 = vector.shape_cast %152 : vector<2x32xbf16> to vector<1x2x32xbf16>
    tpu.vector_store %arg4[%153, %c0_51, %c0_52], %156 {strides = array<i32>} : memref<4x2x32xbf16, #tpu.memory_space<vmem>>, vector<1x2x32xbf16>,
    %c3_i32_53 = arith.constant 3 : i32
    %157 = arith.subi %c3_i32_53, %c2_i32 : i32
    %c0_54 = arith.constant 0 : index
    %158 = arith.index_cast %157 : i32 to index
    %c0_55 = arith.constant 0 : index
    %c0_56 = arith.constant 0 : index
    %159 = vector.load %arg2[%c0_54, %158, %c0_55, %c0_56] : memref<1x4x2x128xbf16, #tpu.memory_space<vmem>>, vector<1x1x2x128xbf16>
    %160 = vector.shape_cast %159 : vector<1x1x2x128xbf16> to vector<2x128xbf16>
    %161 = arith.extf %160 : vector<2x128xbf16> to vector<2x128xf32>
    %162 = arith.truncf %123 : vector<2x32xf32> to vector<2x32xbf16>
    %cst_57 = arith.constant dense<0.000000e+00> : vector<2x128xf32>
    %163 = tpu.matmul %162, %6, %cst_57 {dimension_numbers = #tpu.dot_dimension_numbers<[1], [0], [0], [1], [0, 0, 1, 1], [], []>} : vector<2x32xbf16>, vector<32x128xbf16>, vector<2x128xf32> -> vector<2x128xf32>
    %164 = arith.addf %161, %163 : vector<2x128xf32>
    %165 = vector.extract_strided_slice %164 {offsets = [0, 0], sizes = [2, 96], strides = [1, 1]} : vector<2x128xf32> to vector<2x96xf32>
    %166 = arith.negf %165 : vector<2x96xf32>
    %167 = math.exp %166 : vector<2x96xf32>
    %cst_58 = arith.constant 1.000000e+00 : f32
    %168 = vector.broadcast %cst_58 : f32 to vector<2x96xf32>
    %169 = arith.addf %168, %167 : vector<2x96xf32>
    %170 = arith.divf %168, %169 : vector<2x96xf32>
    %171 = vector.extract_strided_slice %170 {offsets = [0, 0], sizes = [2, 32], strides = [1, 1]} : vector<2x96xf32> to vector<2x32xf32>
    %172 = vector.extract_strided_slice %170 {offsets = [0, 32], sizes = [2, 32], strides = [1, 1]} : vector<2x96xf32> to vector<2x32xf32>
    %173 = vector.extract_strided_slice %170 {offsets = [0, 64], sizes = [2, 32], strides = [1, 1]} : vector<2x96xf32> to vector<2x32xf32>
    %174 = vector.extract_strided_slice %164 {offsets = [0, 96], sizes = [2, 32], strides = [1, 1]} : vector<2x128xf32> to vector<2x32xf32>
    %175 = math.tanh %174 : vector<2x32xf32>
    %176 = arith.mulf %172, %121 : vector<2x32xf32>
    %177 = arith.mulf %171, %175 : vector<2x32xf32>
    %178 = arith.addf %176, %177 : vector<2x32xf32>
    %179 = math.tanh %178 : vector<2x32xf32>
    %180 = arith.mulf %173, %179 : vector<2x32xf32>
    %181 = arith.truncf %180 : vector<2x32xf32> to vector<2x32xbf16>
    %182 = arith.index_cast %157 : i32 to index
    %c0_59 = arith.constant 0 : index
    %c0_60 = arith.constant 0 : index
    %183 = vector.load %arg5[%182, %c0_59, %c0_60] : memref<4x2x32xbf16, #tpu.memory_space<vmem>>, vector<1x2x32xbf16>
    %184 = vector.shape_cast %183 : vector<1x2x32xbf16> to vector<2x32xbf16>
    %185 = vector.shape_cast %181 : vector<2x32xbf16> to vector<1x2x32xbf16>
    tpu.vector_store %arg5[%182, %c0_59, %c0_60], %185 {strides = array<i32>} : memref<4x2x32xbf16, #tpu.memory_space<vmem>>, vector<1x2x32xbf16>,
    %c3_i32_61 = arith.constant 3 : i32
    %c0_62 = arith.constant 0 : index
    %186 = arith.index_cast %c3_i32_61 : i32 to index
    %c0_63 = arith.constant 0 : index
    %c0_64 = arith.constant 0 : index
    %187 = vector.load %arg1[%c0_62, %186, %c0_63, %c0_64] : memref<1x4x2x128xbf16, #tpu.memory_space<vmem>>, vector<1x1x2x128xbf16>
    %188 = vector.shape_cast %187 : vector<1x1x2x128xbf16> to vector<2x128xbf16>
    %189 = arith.extf %188 : vector<2x128xbf16> to vector<2x128xf32>
    %190 = arith.truncf %151 : vector<2x32xf32> to vector<2x32xbf16>
    %cst_65 = arith.constant dense<0.000000e+00> : vector<2x128xf32>
    %191 = tpu.matmul %190, %4, %cst_65 {dimension_numbers = #tpu.dot_dimension_numbers<[1], [0], [0], [1], [0, 0, 1, 1], [], []>} : vector<2x32xbf16>, vector<32x128xbf16>, vector<2x128xf32> -> vector<2x128xf32>
    %192 = arith.addf %189, %191 : vector<2x128xf32>
    %193 = vector.extract_strided_slice %192 {offsets = [0, 0], sizes = [2, 96], strides = [1, 1]} : vector<2x128xf32> to vector<2x96xf32>
    %194 = arith.negf %193 : vector<2x96xf32>
    %195 = math.exp %194 : vector<2x96xf32>
    %cst_66 = arith.constant 1.000000e+00 : f32
    %196 = vector.broadcast %cst_66 : f32 to vector<2x96xf32>
    %197 = arith.addf %196, %195 : vector<2x96xf32>
    %198 = arith.divf %196, %197 : vector<2x96xf32>
    %199 = vector.extract_strided_slice %198 {offsets = [0, 0], sizes = [2, 32], strides = [1, 1]} : vector<2x96xf32> to vector<2x32xf32>
    %200 = vector.extract_strided_slice %198 {offsets = [0, 32], sizes = [2, 32], strides = [1, 1]} : vector<2x96xf32> to vector<2x32xf32>
    %201 = vector.extract_strided_slice %198 {offsets = [0, 64], sizes = [2, 32], strides = [1, 1]} : vector<2x96xf32> to vector<2x32xf32>
    %202 = vector.extract_strided_slice %192 {offsets = [0, 96], sizes = [2, 32], strides = [1, 1]} : vector<2x128xf32> to vector<2x32xf32>
    %203 = math.tanh %202 : vector<2x32xf32>
    %204 = arith.mulf %200, %149 : vector<2x32xf32>
    %205 = arith.mulf %199, %203 : vector<2x32xf32>
    %206 = arith.addf %204, %205 : vector<2x32xf32>
    %207 = math.tanh %206 : vector<2x32xf32>
    %208 = arith.mulf %201, %207 : vector<2x32xf32>
    %209 = arith.truncf %208 : vector<2x32xf32> to vector<2x32xbf16>
    %210 = arith.index_cast %c3_i32_61 : i32 to index
    %c0_67 = arith.constant 0 : index
    %c0_68 = arith.constant 0 : index
    %211 = vector.load %arg4[%210, %c0_67, %c0_68] : memref<4x2x32xbf16, #tpu.memory_space<vmem>>, vector<1x2x32xbf16>
    %212 = vector.shape_cast %211 : vector<1x2x32xbf16> to vector<2x32xbf16>
    %213 = vector.shape_cast %209 : vector<2x32xbf16> to vector<1x2x32xbf16>
    tpu.vector_store %arg4[%210, %c0_67, %c0_68], %213 {strides = array<i32>} : memref<4x2x32xbf16, #tpu.memory_space<vmem>>, vector<1x2x32xbf16>,
    %c3_i32_69 = arith.constant 3 : i32
    %214 = arith.subi %c3_i32_69, %c3_i32_61 : i32
    %c0_70 = arith.constant 0 : index
    %215 = arith.index_cast %214 : i32 to index
    %c0_71 = arith.constant 0 : index
    %c0_72 = arith.constant 0 : index
    %216 = vector.load %arg2[%c0_70, %215, %c0_71, %c0_72] : memref<1x4x2x128xbf16, #tpu.memory_space<vmem>>, vector<1x1x2x128xbf16>
    %217 = vector.shape_cast %216 : vector<1x1x2x128xbf16> to vector<2x128xbf16>
    %218 = arith.extf %217 : vector<2x128xbf16> to vector<2x128xf32>
    %219 = arith.truncf %180 : vector<2x32xf32> to vector<2x32xbf16>
    %cst_73 = arith.constant dense<0.000000e+00> : vector<2x128xf32>
    %220 = tpu.matmul %219, %6, %cst_73 {dimension_numbers = #tpu.dot_dimension_numbers<[1], [0], [0], [1], [0, 0, 1, 1], [], []>} : vector<2x32xbf16>, vector<32x128xbf16>, vector<2x128xf32> -> vector<2x128xf32>
    %221 = arith.addf %218, %220 : vector<2x128xf32>
    %222 = vector.extract_strided_slice %221 {offsets = [0, 0], sizes = [2, 96], strides = [1, 1]} : vector<2x128xf32> to vector<2x96xf32>
    %223 = arith.negf %222 : vector<2x96xf32>
    %224 = math.exp %223 : vector<2x96xf32>
    %cst_74 = arith.constant 1.000000e+00 : f32
    %225 = vector.broadcast %cst_74 : f32 to vector<2x96xf32>
    %226 = arith.addf %225, %224 : vector<2x96xf32>
    %227 = arith.divf %225, %226 : vector<2x96xf32>
    %228 = vector.extract_strided_slice %227 {offsets = [0, 0], sizes = [2, 32], strides = [1, 1]} : vector<2x96xf32> to vector<2x32xf32>
    %229 = vector.extract_strided_slice %227 {offsets = [0, 32], sizes = [2, 32], strides = [1, 1]} : vector<2x96xf32> to vector<2x32xf32>
    %230 = vector.extract_strided_slice %227 {offsets = [0, 64], sizes = [2, 32], strides = [1, 1]} : vector<2x96xf32> to vector<2x32xf32>
    %231 = vector.extract_strided_slice %221 {offsets = [0, 96], sizes = [2, 32], strides = [1, 1]} : vector<2x128xf32> to vector<2x32xf32>
    %232 = math.tanh %231 : vector<2x32xf32>
    %233 = arith.mulf %229, %178 : vector<2x32xf32>
    %234 = arith.mulf %228, %232 : vector<2x32xf32>
    %235 = arith.addf %233, %234 : vector<2x32xf32>
    %236 = math.tanh %235 : vector<2x32xf32>
    %237 = arith.mulf %230, %236 : vector<2x32xf32>
    %238 = arith.truncf %237 : vector<2x32xf32> to vector<2x32xbf16>
    %239 = arith.index_cast %214 : i32 to index
    %c0_75 = arith.constant 0 : index
    %c0_76 = arith.constant 0 : index
    %240 = vector.load %arg5[%239, %c0_75, %c0_76] : memref<4x2x32xbf16, #tpu.memory_space<vmem>>, vector<1x2x32xbf16>
    %241 = vector.shape_cast %240 : vector<1x2x32xbf16> to vector<2x32xbf16>
    %242 = vector.shape_cast %238 : vector<2x32xbf16> to vector<1x2x32xbf16>
    tpu.vector_store %arg5[%239, %c0_75, %c0_76], %242 {strides = array<i32>} : memref<4x2x32xbf16, #tpu.memory_space<vmem>>, vector<1x2x32xbf16>,
    %c4_i32 = arith.constant 4 : i32
    %c0_77 = arith.constant 0 : index
    %c0_78 = arith.constant 0 : index
    %c0_79 = arith.constant 0 : index
    %243 = vector.load %arg6[%c0_77, %c0_78, %c0_79] : memref<2x2x32xf32, #tpu.memory_space<vmem>>, vector<1x2x32xf32>
    %244 = vector.shape_cast %243 : vector<1x2x32xf32> to vector<2x32xf32>
    %245 = vector.shape_cast %208 : vector<2x32xf32> to vector<1x2x32xf32>
    tpu.vector_store %arg6[%c0_77, %c0_78, %c0_79], %245 {strides = array<i32>} : memref<2x2x32xf32, #tpu.memory_space<vmem>>, vector<1x2x32xf32>,
    %c0_80 = arith.constant 0 : index
    %c0_81 = arith.constant 0 : index
    %c0_82 = arith.constant 0 : index
    %246 = vector.load %arg7[%c0_80, %c0_81, %c0_82] : memref<2x2x32xf32, #tpu.memory_space<vmem>>, vector<1x2x32xf32>
    %247 = vector.shape_cast %246 : vector<1x2x32xf32> to vector<2x32xf32>
    %248 = vector.shape_cast %206 : vector<2x32xf32> to vector<1x2x32xf32>
    tpu.vector_store %arg7[%c0_80, %c0_81, %c0_82], %248 {strides = array<i32>} : memref<2x2x32xf32, #tpu.memory_space<vmem>>, vector<1x2x32xf32>,
    %c1_83 = arith.constant 1 : index
    %c0_84 = arith.constant 0 : index
    %c0_85 = arith.constant 0 : index
    %249 = vector.load %arg6[%c1_83, %c0_84, %c0_85] : memref<2x2x32xf32, #tpu.memory_space<vmem>>, vector<1x2x32xf32>
    %250 = vector.shape_cast %249 : vector<1x2x32xf32> to vector<2x32xf32>
    %251 = vector.shape_cast %237 : vector<2x32xf32> to vector<1x2x32xf32>
    tpu.vector_store %arg6[%c1_83, %c0_84, %c0_85], %251 {strides = array<i32>} : memref<2x2x32xf32, #tpu.memory_space<vmem>>, vector<1x2x32xf32>,
    %c1_86 = arith.constant 1 : index
    %c0_87 = arith.constant 0 : index
    %c0_88 = arith.constant 0 : index
    %252 = vector.load %arg7[%c1_86, %c0_87, %c0_88] : memref<2x2x32xf32, #tpu.memory_space<vmem>>, vector<1x2x32xf32>
    %253 = vector.shape_cast %252 : vector<1x2x32xf32> to vector<2x32xf32>
    %254 = vector.shape_cast %235 : vector<2x32xf32> to vector<1x2x32xf32>
    tpu.vector_store %arg7[%c1_86, %c0_87, %c0_88], %254 {strides = array<i32>} : memref<2x2x32xf32, #tpu.memory_space<vmem>>, vector<1x2x32xf32>,
    return
  }
  func.func @transform_0(%arg0: i32) -> (i32, i32, i32, i32) {
    %c0_i32 = arith.constant 0 : i32
    %c0_i32_0 = arith.constant 0 : i32
    %c0_i32_1 = arith.constant 0 : i32
    %c0_i32_2 = arith.constant 0 : i32
    return %c0_i32, %arg0, %c0_i32_0, %c0_i32_1 : i32, i32, i32, i32
  }
  func.func @transform_1(%arg0: i32) -> (i32, i32, i32, i32) {
    %c2_i32 = arith.constant 2 : i32
    %0 = arith.subi %c2_i32, %arg0 : i32
    %c1_i32 = arith.constant 1 : i32
    %c0_i32 = arith.constant 0 : i32
    %c0_i32_0 = arith.constant 0 : i32
    %c0_i32_1 = arith.constant 0 : i32
    return %c1_i32, %0, %c0_i32, %c0_i32_0 : i32, i32, i32, i32
  }
  func.func @transform_2(%arg0: i32) -> (i32, i32, i32) {
    %c0_i32 = arith.constant 0 : i32
    %c0_i32_0 = arith.constant 0 : i32
    %c0_i32_1 = arith.constant 0 : i32
    %c0_i32_2 = arith.constant 0 : i32
    return %c0_i32, %c0_i32_0, %c0_i32_1 : i32, i32, i32
  }
  func.func @transform_3(%arg0: i32) -> (i32, i32, i32) {
    %c0_i32 = arith.constant 0 : i32
    %c0_i32_0 = arith.constant 0 : i32
    %c0_i32_1 = arith.constant 0 : i32
    return %arg0, %c0_i32, %c0_i32_0 : i32, i32, i32
  }
  func.func @transform_4(%arg0: i32) -> (i32, i32, i32) {
    %c2_i32 = arith.constant 2 : i32
    %0 = arith.subi %c2_i32, %arg0 : i32
    %c0_i32 = arith.constant 0 : i32
    %c0_i32_0 = arith.constant 0 : i32
    %c0_i32_1 = arith.constant 0 : i32
    return %0, %c0_i32, %c0_i32_0 : i32, i32, i32
  }
}

</mosaic_0001>

<bundles_post_ra>
// kernel: _lambda_.2
= control target key start
LH: loop header
LB: loop body
LE: loop exit
PB: predicated region body
PF: predicated region fallthrough
CT: control target
= control target key end

     0   :  { %s1467_s15 = smov 0   ;;  %s1686_s0 = inlined_call_operand.vmem [shape: bf16[2,12,2,128], index: 0, kind: input, shape index: {}, may-alias: {0,1}]   ;;  %s1687_s1 = inlined_call_operand.vmem [shape: bf16[2,12,2,128], index: 1, kind: input, shape index: {}, may-alias: {0,1}]   ;;  %s1688_s2 = inlined_call_operand.vmem [shape: bf16[2,32,128], index: 2, kind: input, shape index: {}]   ;;  %s1689_s3 = inlined_call_operand.vmem [shape: bf16[12,2,32], index: 3, kind: output, shape index: {0}]   ;;  %s1690_s4 = inlined_call_operand.vmem [shape: bf16[12,2,32], index: 4, kind: output, shape index: {1}]  }
   0x1 LB: > { %s1203_s16 = sadd.s32 4294967295, %s1432_s15   ;;  %p1207_p0 = scmp.ge.s32.totalorder %s1432_s15, 1  ;;  %s1432_s15 = sphi %s1467_s15, %s15_s15  }
   0x2   : > { %p182_p1 = scmp.lt.s32.totalorder %s1432_s15, 4 }
   0x4   : > { %p183_p2 = pnand %p1207_p0, %p182_p1 }
   0x5   : > { %s1208_s17 = sshll.u32 (!%p183_p2), %s1203_s16, 2  ;;  %s222_s18 = ssub.s32 (!%p183_p2), 2, %s1203_s16 }
   0x6   : > { %186 = sbr.rel (%p183_p2) target bundleno = 2861 (0xb2d), region = 32  ;;  %p218_p3 = scmp.lt.s32.totalorder (!%p183_p2), %s1208_s17, 11 }
   0x7   : > { %s1209_s19 = sshll.u32 (!%p183_p2), %s222_s18, 2  ;;  %p1212_p5 = scmp.ne.s32.totalorder (!%p183_p2), %s1203_s16, 0 }
   0x8   : > { %p224_p4 = scmp.lt.s32.totalorder (!%p183_p2), %s1209_s19, 11 }
   0xd   : > { %s1692_s17 = smov (!%p218_p3, %s1208_s17), 11  ;;  %s1694_s19 = smov (!%p224_p4, %s1209_s19), 11 }
   0xe   : > { %s1478_s22 = scalar_lea.vmem %s1686_s0, %s1692_s17  ;;  %s1483_s25 = scalar_lea.vmem %s1689_s3, %s1692_s17  ;;  %vm247_vm0 = vcmask (!%p1212_p5), 254976   ;;  %v1434_v0 = vmov (!%p1212_p5), 0.0  }
   0xf   : > { %s1488_s28 = scalar_lea.vmem %s1687_s1, %s1694_s19  ;;  %s1493_s5 = scalar_lea.vmem %s1690_s4, %s1694_s19  ;;  %248 = vst.msk [vmem:[#allocation2] sm:$0x3] (!%p1212_p5), %vm247_vm0, %v1434_v0  ;;  %249 = vst.msk [vmem:[#allocation2 + $0x2] sm:$0x3] (!%p1212_p5), %vm247_vm0, %v1434_v0 }
  0x10   : > { %246 = sbr.rel (%p1212_p5) target bundleno = 23 (0x17), region = 36  ;;  %250 = vst.msk [vmem:[#allocation3] sm:$0x3] (!%p1212_p5), %vm247_vm0, %v1434_v0  ;;  %251 = vst.msk [vmem:[#allocation3 + $0x2] sm:$0x3] (!%p1212_p5), %vm247_vm0, %v1434_v0 }
  0x17 PF: > { %v1498_v1 = vld [vmem:[%s1688_s2] sm:$0xff]   ;;  %v1435_v2 = vmov 0.0   ;;  %v1505_v3 = vld [vmem:[%s1688_s2 + $0x10] sm:$0xff]   ;;  %v1511_v4 = vld [vmem:[%s1688_s2 + $0x8] sm:$0xff]   ;;  %vm1436_vm1 = vmmov 0   ;;  %vm282_vm2 = vcmask 261120  }
  0x18   : > { %1278 = vmatprep.subr.bf16.mxu0 %v1435_v2  ;;  %1286 = vmatprep.subr.bf16.mxu1 %v1435_v2  ;;  %v1520_v5 = vld [vmem:[%s1688_s2 + $0x18] sm:$0xff]   ;;  %v261_v6 = vld [vmem:[#allocation2] sm:$0x3]  ;;  %v263_v7 = vld [vmem:[#allocation2 + $0x2] sm:$0x3]  ;;  %s1437_s14 = smov 32  }
  0x19   : > { %1279 = vmatpush3.bf16.msra.mxu0 %v1498_v1  ;;  %1282 = vmatprep.mubr.msk.bf16.mxu0 %vm1436_vm1, %v1435_v2  ;;  %v269_v8 = vpack.c.bf16 %v261_v6, %v261_v6  ;;  %v1221_v9 = vld.sshfl [vmem:[#allocation3] sm:$0x3 pattern:$0x76325410]  ;;  %v386_v10 = vpack.c.bf16 %v263_v7, %v263_v7  ;;  %v267_v12 = vld [vmem:[%s1478_s22] sm:$0x1] }
  0x1a   : > { %1287 = vmatpush3.bf16.msra.mxu1 %v1505_v3  ;;  %1280 = vmatprep.subr.bf16.mxu0 %v1435_v2  ;;  %v1227_v11 = vld.sshfl [vmem:[#allocation3 + $0x2] sm:$0x3 pattern:$0x76325410]  ;;  %v1222_v13 = vld [vmem:[%s1488_s28 + $0xf] sm:$0x1]  ;;  %v268_v14 = vunpack.c.l.bf16 %v267_v12 }
  0x1b   : > { %1288 = vmatprep.subr.bf16.mxu1 %v1435_v2  ;;  %1290 = vmatprep.mubr.msk.bf16.mxu1 %vm1436_vm1, %v1435_v2  ;;  %v385_v15 = vunpack.c.l.bf16 %v1222_v13  ;;  %s1438_s16 = smov 64   ;;  %v1229_v58 = vld [vmem:[%s1478_s22 + $0x1] sm:$0x1]  ;;  %v1233_v60 = vld [vmem:[%s1488_s28 + $0xe] sm:$0x1]  ;;  %s1441_s17 = smov 96  }
  0x1c   : > { %342 = vrot.lane.b32.xlu1 %v1221_v9, %s1437_s14  ;;  %v501_v59 = vunpack.c.l.bf16 %v1229_v58  ;;  %v595_v0 = vunpack.c.l.bf16 %v1233_v60  ;;  %vm381_vm3 = vcmask 253952   ;;  %vm1072_vm4 = vcmask 254976  }
  0x1d   : > { %1281 = vmatpush3.bf16.msra.mxu0 %v1511_v4 }
  0x1e   : > { %1289 = vmatpush3.bf16.msra.mxu1 %v1520_v5  ;;  %1294 = vmatprep.subr.bf16.mxu0 %v1435_v2 }
  0x1f   : > { %1302 = vmatprep.subr.bf16.mxu1 %v1435_v2 }
  0x20   : > { %1283 = vmatmul.mubr.msk.bf16.vlgmr.msra.gmra.mrb[0].mxu0 %vm282_vm2, %v269_v8  ;;  %458 = vrot.lane.b32.xlu1 %v1227_v11, %s1437_s14 }
  0x21   : > { %1291 = vmatmul.mubr.msk.bf16.vlgmr.msra.gmra.mrb[0].mxu1 %vm282_vm2, %v386_v10  ;;  %1295 = vmatpush3.bf16.msra.mxu0 %v1498_v1 }
  0x22   : > { %1303 = vmatpush3.bf16.msra.mxu1 %v1505_v3  ;;  %1296 = vmatprep.subr.bf16.mxu0 %v1435_v2 }
  0x23   : > { %1298 = vmatprep.mubr.msk.bf16.mxu0 %vm1436_vm1, %v1435_v2  ;;  %1304 = vmatprep.subr.bf16.mxu1 %v1435_v2 }
  0x24   : > { %1306 = vmatprep.mubr.msk.bf16.mxu1 %vm1436_vm1, %v1435_v2 }
  0x25   : > { %1297 = vmatpush3.bf16.msra.mxu0 %v1511_v4 }
  0x26   : > { %1305 = vmatpush3.bf16.msra.mxu1 %v1520_v5  ;;  %1310 = vmatprep.subr.bf16.mxu0 %v1435_v2 }
  0x27   : > { %1318 = vmatprep.subr.bf16.mxu1 %v1435_v2 }
  0x8e   : > { %v343_v40 = vpop.permute.xlu1 %342 }
  0x92   : > { %v459_v42 = vpop.permute.xlu1 %458 }
  0xf3   : > { %v320_v16 = vpop.f32.mrb[0].mxu0 }
  0xf4   : > { %v326_v17 = vadd.f32 %v320_v16, %v268_v14  ;;  %v1284_v18 = vpop.f32.mrb[1].mxu0  ;;  %v436_v19 = vpop.f32.mrb[0].mxu1 }
  0xf5   : > { %v442_v20 = vadd.f32 %v436_v19, %v385_v15  ;;  %v323_v21 = vpop.f32.mrb[2].mxu0  ;;  %v1292_v22 = vpop.f32.mrb[1].mxu1 }
  0xf6   : > { %1362 = vtanh.f32 %v326_v17  ;;  %v1285_v23 = vpop.f32.mrb[3].mxu0  ;;  %v439_v24 = vpop.f32.mrb[2].mxu1  ;;  %v1220_v28 = vmul.f32 -1.442695, %v326_v17 }
  0xf7   : > { %v1293_v25 = vpop.f32.mrb[3].mxu1  ;;  %1364 = vtanh.f32 %v442_v20  ;;  %v1226_v29 = vmul.f32 -1.442695, %v442_v20 }
  0xf8   : > { %1366 = vpow2.f32 %v1220_v28 }
  0xf9   : > { %1368 = vpow2.f32 %v1226_v29 }
 0x100   : > { %v1363_v26 = vpop.eup %1362 }
 0x101   : > { %347 = vrot.lane.b32.xlu0 %v1363_v26, %s1437_s14  ;;  %v1365_v27 = vpop.eup %1364 }
 0x102   : > { %v1367_v30 = vpop.eup %1366 }
 0x103   : > { %v330_v31 = vadd.f32 1.0, %v1367_v30  ;;  %v1369_v32 = vpop.eup %1368 }
 0x104   : > { %v446_v33 = vadd.f32 1.0, %v1369_v32 }
 0x105   : > { %463 = vrot.lane.b32.xlu0 %v1365_v27, %s1437_s14  ;;  %1370 = vrcp.f32 %v330_v31 }
 0x106   : > { %1372 = vrcp.f32 %v446_v33 }
 0x10f   : > { %v1371_v34 = vpop.eup %1370 }
 0x110   : > { %v1373_v37 = vpop.eup %1372  ;;  %v345_v41 = vmul.f32 %v1371_v34, %v343_v40 }
 0x111   : > { %v461_v45 = vmul.f32 %v1373_v37, %v459_v42 }
 0x173   : > { %v348_v35 = vpop.permute.xlu0 %347 }
 0x174   : > { %v350_v36 = vmul.f32 %v1371_v34, %v348_v35 }
 0x176   : > { %352 = vrot.lane.b32.xlu0 %v350_v36, %s1437_s14 }
 0x177   : > { %v464_v38 = vpop.permute.xlu0 %463 }
 0x178   : > { %v466_v39 = vmul.f32 %v1373_v37, %v464_v38 }
 0x17a   : > { %468 = vrot.lane.b32.xlu1 %v466_v39, %s1437_s14 }
 0x1e8   : > { %v353_v43 = vpop.permute.xlu0 %352 }
 0x1e9   : > { %v1551_v44 = vadd.f32 %v353_v43, %v345_v41 }
 0x1eb   : > { %1374 = vtanh.f32 %v1551_v44 }
 0x1ec   : > { %v469_v46 = vpop.permute.xlu1 %468 }
 0x1ed   : > { %v1554_v47 = vadd.f32 %v469_v46, %v461_v45 }
 0x1ef   : > { %1376 = vtanh.f32 %v1554_v47 }
 0x1f5   : > { %v1375_v48 = vpop.eup %1374 }
 0x1f6   : > { %358 = vrot.lane.b32.xlu0 %v1375_v48, %s1437_s14 }
 0x1f9   : > { %v1377_v49 = vpop.eup %1376 }
 0x1fa   : > { %474 = vrot.lane.b32.xlu1 %v1377_v49, %s1437_s14 }
 0x268   : > { %v359_v50 = vpop.permute.xlu0 %358 }
 0x269   : > { %v361_v51 = vmul.f32 %v1371_v34, %v359_v50 }
 0x26b   : > { %v1559_v52 = vpack.c.bf16 %v361_v51, %v361_v51 }
 0x26c   : > { %v475_v53 = vpop.permute.xlu1 %474 }
 0x26d   : > { %v477_v54 = vmul.f32 %v1373_v37, %v475_v53  ;;  %502 = vrot.lane.b32.xlu0 %v1559_v52, %s1438_s16 }
 0x26f   : > { %v1563_v55 = vpack.c.bf16 %v477_v54, %v477_v54 }
 0x271   : > { %596 = vrot.lane.b32.xlu1 %v1563_v55, %s1438_s16 }
 0x2df   : > { %v503_v56 = vpop.permute.xlu0 %502 }
 0x2e0   : > { %1299 = vmatmul.mubr.msk.bf16.vlgmr.msra.gmra.mrb[4].mxu0 %vm282_vm2, %v503_v56 }
 0x2e1   : > { %1311 = vmatpush3.bf16.msra.mxu0 %v1498_v1  ;;  %1314 = vmatprep.mubr.msk.bf16.mxu0 %vm1436_vm1, %v1435_v2 }
 0x2e2   : > { %1312 = vmatprep.subr.bf16.mxu0 %v1435_v2 }
 0x2e3   : > { %v597_v57 = vpop.permute.xlu1 %596 }
 0x2e4   : > { %1307 = vmatmul.mubr.msk.bf16.vlgmr.msra.gmra.mrb[4].mxu1 %vm282_vm2, %v597_v57 }
 0x2e5   : > { %1319 = vmatpush3.bf16.msra.mxu1 %v1505_v3  ;;  %1313 = vmatpush3.bf16.msra.mxu0 %v1511_v4 }
 0x2e6   : > { %1320 = vmatprep.subr.bf16.mxu1 %v1435_v2  ;;  %1322 = vmatprep.mubr.msk.bf16.mxu1 %vm1436_vm1, %v1435_v2 }
 0x2e7   : > { %1326 = vmatprep.subr.bf16.mxu0 %v1435_v2 }
 0x2e9   : > { %1321 = vmatpush3.bf16.msra.mxu1 %v1520_v5 }
 0x2ea   : > { %1334 = vmatprep.subr.bf16.mxu1 %v1435_v2 }
 0x3b3   : > { %v541_v61 = vpop.f32.mrb[4].mxu0 }
 0x3b4   : > { %v547_v62 = vadd.f32 %v541_v61, %v501_v59  ;;  %v1300_v63 = vpop.f32.mrb[5].mxu0 }
 0x3b5   : > { %v544_v6 = vpop.f32.mrb[6].mxu0 }
 0x3b6   : > { %1378 = vtanh.f32 %v547_v62  ;;  %v1301_v7 = vpop.f32.mrb[7].mxu0  ;;  %v1231_v15 = vmul.f32 -1.442695, %v547_v62 }
 0x3b7   : > { %v635_v8 = vpop.f32.mrb[4].mxu1 }
 0x3b8   : > { %v641_v9 = vadd.f32 %v635_v8, %v595_v0  ;;  %v1308_v10 = vpop.f32.mrb[5].mxu1 }
 0x3b9   : > { %v638_v11 = vpop.f32.mrb[6].mxu1 }
 0x3ba   : > { %1380 = vtanh.f32 %v641_v9  ;;  %v1309_v12 = vpop.f32.mrb[7].mxu1  ;;  %v1235_v16 = vmul.f32 -1.442695, %v641_v9 }
 0x3bb   : > { %1382 = vpow2.f32 %v1231_v15 }
 0x3bc   : > { %1384 = vpow2.f32 %v1235_v16 }
 0x3c0   : > { %v1379_v13 = vpop.eup %1378 }
 0x3c1   : > { %557 = vrot.lane.b32.xlu0 %v1379_v13, %s1437_s14 }
 0x3c4   : > { %v1381_v14 = vpop.eup %1380 }
 0x3c5   : > { %651 = vrot.lane.b32.xlu1 %v1381_v14, %s1437_s14  ;;  %v1383_v17 = vpop.eup %1382 }
 0x3c6   : > { %v551_v18 = vadd.f32 1.0, %v1383_v17  ;;  %v1385_v19 = vpop.eup %1384 }
 0x3c7   : > { %v645_v20 = vadd.f32 1.0, %v1385_v19 }
 0x3c8   : > { %1386 = vrcp.f32 %v551_v18 }
 0x3c9   : > { %1388 = vrcp.f32 %v645_v20 }
 0x3d2   : > { %v1387_v21 = vpop.eup %1386 }
 0x3d3   : > { %v1389_v24 = vpop.eup %1388  ;;  %v555_v27 = vmul.f32 %v1387_v21, %v1551_v44  ;;  %v1241_v44 = vld [vmem:[%s1488_s28 + $0xd] sm:$0x1] }
 0x3d4   : > { %v649_v30 = vmul.f32 %v1389_v24, %v1554_v47  ;;  %v783_v48 = vunpack.c.l.bf16 %v1241_v44 }
 0x433   : > { %v558_v22 = vpop.permute.xlu0 %557 }
 0x434   : > { %v560_v23 = vmul.f32 %v1387_v21, %v558_v22 }
 0x436   : > { %562 = vrot.lane.b32.xlu0 %v560_v23, %s1437_s14 }
 0x437   : > { %v652_v25 = vpop.permute.xlu1 %651 }
 0x438   : > { %v654_v26 = vmul.f32 %v1389_v24, %v652_v25  ;;  %v1245_v25 = vld [vmem:[%s1478_s22 + $0x3] sm:$0x1] }
 0x43a   : > { %656 = vrot.lane.b32.xlu1 %v654_v26, %s1437_s14  ;;  %v877_v26 = vunpack.c.l.bf16 %v1245_v25 }
 0x4a8   : > { %v563_v28 = vpop.permute.xlu0 %562 }
 0x4a9   : > { %v1588_v29 = vadd.f32 %v563_v28, %v555_v27  ;;  %v1249_v27 = vld [vmem:[%s1488_s28 + $0xc] sm:$0x1] }
 0x4ab   : > { %1390 = vtanh.f32 %v1588_v29 }
 0x4ac   : > { %v657_v31 = vpop.permute.xlu1 %656 }
 0x4ad   : > { %v1592_v32 = vadd.f32 %v657_v31, %v649_v30  ;;  %v970_v31 = vunpack.c.l.bf16 %v1249_v27 }
 0x4af   : > { %1392 = vtanh.f32 %v1592_v32 }
 0x4b5   : > { %v1391_v33 = vpop.eup %1390 }
 0x4b6   : > { %568 = vrot.lane.b32.xlu0 %v1391_v33, %s1437_s14 }
 0x4b9   : > { %v1393_v34 = vpop.eup %1392 }
 0x4ba   : > { %662 = vrot.lane.b32.xlu1 %v1393_v34, %s1437_s14 }
 0x528   : > { %v569_v35 = vpop.permute.xlu0 %568 }
 0x529   : > { %v571_v36 = vmul.f32 %v1387_v21, %v569_v35 }
 0x52b   : > { %v1597_v37 = vpack.c.bf16 %v571_v36, %v571_v36 }
 0x52c   : > { %v663_v38 = vpop.permute.xlu1 %662 }
 0x52d   : > { %v665_v39 = vmul.f32 %v1389_v24, %v663_v38  ;;  %690 = vrot.lane.b32.xlu0 %v1597_v37, %s1438_s16 }
 0x52f   : > { %v1601_v40 = vpack.c.bf16 %v665_v39, %v665_v39 }
 0x531   : > { %784 = vrot.lane.b32.xlu1 %v1601_v40, %s1438_s16 }
 0x59f   : > { %v691_v41 = vpop.permute.xlu0 %690 }
 0x5a0   : > { %1315 = vmatmul.mubr.msk.bf16.vlgmr.msra.gmra.mrb[8].mxu0 %vm282_vm2, %v691_v41 }
 0x5a1   : > { %1327 = vmatpush3.bf16.msra.mxu0 %v1498_v1  ;;  %1330 = vmatprep.mubr.msk.bf16.mxu0 %vm1436_vm1, %v1435_v2  ;;  %v1237_v1 = vld [vmem:[%s1478_s22 + $0x2] sm:$0x1] }
 0x5a2   : > { %1328 = vmatprep.subr.bf16.mxu0 %v1435_v2  ;;  %v689_v43 = vunpack.c.l.bf16 %v1237_v1 }
 0x5a3   : > { %v785_v42 = vpop.permute.xlu1 %784 }
 0x5a4   : > { %1323 = vmatmul.mubr.msk.bf16.vlgmr.msra.gmra.mrb[8].mxu1 %vm282_vm2, %v785_v42 }
 0x5a5   : > { %1335 = vmatpush3.bf16.msra.mxu1 %v1505_v3  ;;  %1329 = vmatpush3.bf16.msra.mxu0 %v1511_v4 }
 0x5a6   : > { %1336 = vmatprep.subr.bf16.mxu1 %v1435_v2  ;;  %1338 = vmatprep.mubr.msk.bf16.mxu1 %vm1436_vm1, %v1435_v2 }
 0x5a9   : > { %1337 = vmatpush3.bf16.msra.mxu1 %v1520_v5 }
 0x673   : > { %v729_v45 = vpop.f32.mrb[8].mxu0 }
 0x674   : > { %v735_v46 = vadd.f32 %v729_v45, %v689_v43  ;;  %v1316_v47 = vpop.f32.mrb[9].mxu0 }
 0x675   : > { %v732_v49 = vpop.f32.mrb[10].mxu0 }
 0x676   : > { %1394 = vtanh.f32 %v735_v46  ;;  %v1317_v50 = vpop.f32.mrb[11].mxu0  ;;  %v1239_v5 = vmul.f32 -1.442695, %v735_v46 }
 0x677   : > { %v823_v3 = vpop.f32.mrb[8].mxu1 }
 0x678   : > { %v829_v51 = vadd.f32 %v823_v3, %v783_v48  ;;  %v1324_v4 = vpop.f32.mrb[9].mxu1 }
 0x679   : > { %v826_v53 = vpop.f32.mrb[10].mxu1 }
 0x67a   : > { %1396 = vtanh.f32 %v829_v51  ;;  %v1325_v54 = vpop.f32.mrb[11].mxu1  ;;  %v1243_v57 = vmul.f32 -1.442695, %v829_v51 }
 0x67b   : > { %1398 = vpow2.f32 %v1239_v5  ;;  %v1439_v54 = vmov 1966171168  }
 0x67c   : > { %1400 = vpow2.f32 %v1243_v57 }
 0x680   : > { %v1395_v56 = vpop.eup %1394 }
 0x681   : > { %745 = vrot.lane.b32.xlu0 %v1395_v56, %s1437_s14  ;;  %v365_v56 = vunpack.c.l.s4 %v1439_v54 }
 0x684   : > { %v1397_v2 = vpop.eup %1396 }
 0x685   : > { %839 = vrot.lane.b32.xlu1 %v1397_v2, %s1437_s14  ;;  %v1399_v58 = vpop.eup %1398  ;;  %v367_v2 = vlaneseq }
 0x686   : > { %v739_v59 = vadd.f32 1.0, %v1399_v58  ;;  %v1401_v60 = vpop.eup %1400 }
 0x687   : > { %v833_v61 = vadd.f32 1.0, %v1401_v60  ;;  %v368_v60 = vshrl.u32 %v367_v2, 7 }
 0x688   : > { %1402 = vrcp.f32 %v739_v59  ;;  %v366_v59 = vunpack.c.0.s8 %v365_v56 }
 0x689   : > { %1404 = vrcp.f32 %v833_v61 }
 0x692   : > { %v1403_v62 = vpop.eup %1402 }
 0x693   : > { %v1405_v6 = vpop.eup %1404  ;;  %v743_v9 = vmul.f32 %v1403_v62, %v1588_v29 }
 0x694   : > { %v837_v12 = vmul.f32 %v1405_v6, %v1592_v32 }
 0x6f3   : > { %v746_v63 = vpop.permute.xlu0 %745 }
 0x6f4   : > { %v748_v0 = vmul.f32 %v1403_v62, %v746_v63  ;;  %v369_v63 = vsub.s32 %v366_v59, %v368_v60 }
 0x6f6   : > { %750 = vrot.lane.b32.xlu0 %v748_v0, %s1437_s14  ;;  %v370_v0 = vrot.slane %v1559_v52, %v369_v63 }
 0x6f7   : > { %v840_v7 = vpop.permute.xlu1 %839 }
 0x6f8   : > { %v842_v8 = vmul.f32 %v1405_v6, %v840_v7  ;;  %v486_v7 = vrot.slane %v1563_v55, %v369_v63 }
 0x6fa   : > { %844 = vrot.lane.b32.xlu1 %v842_v8, %s1437_s14  ;;  %v580_v8 = vrot.slane %v1597_v37, %v369_v63 }
 0x768   : > { %v751_v10 = vpop.permute.xlu0 %750 }
 0x769   : > { %v753_v11 = vadd.f32 %v751_v10, %v743_v9  ;;  %v377_v9 = vrot.slane %v370_v0, %v369_v63 }
 0x76b   : > { %1406 = vtanh.f32 %v753_v11 }
 0x76c   : > { %v845_v13 = vpop.permute.xlu1 %844 }
 0x76d   : > { %v1625_v14 = vadd.f32 %v845_v13, %v837_v12  ;;  %v674_v12 = vrot.slane %v1601_v40, %v369_v63 }
 0x76f   : > { %1408 = vtanh.f32 %v1625_v14 }
 0x775   : > { %v1407_v15 = vpop.eup %1406 }
 0x776   : > { %756 = vrot.lane.b32.xlu0 %v1407_v15, %s1437_s14  ;;  %v587_v15 = vrot.slane %v580_v8, %v369_v63 }
 0x779   : > { %v1409_v16 = vpop.eup %1408 }
 0x77a   : > { %850 = vrot.lane.b32.xlu1 %v1409_v16, %s1437_s14  ;;  %v681_v16 = vrot.slane %v674_v12, %v369_v63 }
 0x7e8   : > { %v757_v17 = vpop.permute.xlu0 %756 }
 0x7e9   : > { %v759_v18 = vmul.f32 %v1403_v62, %v757_v17 }
 0x7eb   : > { %v1630_v19 = vpack.c.bf16 %v759_v18, %v759_v18 }
 0x7ec   : > { %v851_v20 = vpop.permute.xlu1 %850 }
 0x7ed   : > { %v853_v21 = vmul.f32 %v1405_v6, %v851_v20  ;;  %878 = vrot.lane.b32.xlu0 %v1630_v19, %s1438_s16  ;;  %v768_v13 = vrot.slane %v1630_v19, %v369_v63 }
 0x7ef   : > { %v1634_v22 = vpack.c.bf16 %v853_v21, %v853_v21  ;;  %v775_v17 = vrot.slane %v768_v13, %v369_v63 }
 0x7f1   : > { %971 = vrot.lane.b32.xlu1 %v1634_v22, %s1438_s16  ;;  %v862_v55 = vrot.slane %v1634_v22, %v369_v63 }
 0x7f3   : > { %v869_v18 = vrot.slane %v862_v55, %v369_v63 }
 0x85f   : > { %v879_v23 = vpop.permute.xlu0 %878 }
 0x860   : > { %1331 = vmatmul.mubr.msk.bf16.vlgmr.msra.gmra.mrb[12].mxu0 %vm282_vm2, %v879_v23 }
 0x863   : > { %v972_v24 = vpop.permute.xlu1 %971 }
 0x864   : > { %1339 = vmatmul.mubr.msk.bf16.vlgmr.msra.gmra.mrb[12].mxu1 %vm282_vm2, %v972_v24 }
 0x933   : > { %v917_v28 = vpop.f32.mrb[12].mxu0 }
 0x934   : > { %v923_v29 = vadd.f32 %v917_v28, %v877_v26  ;;  %v1332_v30 = vpop.f32.mrb[13].mxu0 }
 0x935   : > { %v920_v32 = vpop.f32.mrb[14].mxu0 }
 0x936   : > { %1410 = vtanh.f32 %v923_v29  ;;  %v1333_v33 = vpop.f32.mrb[15].mxu0  ;;  %v1247_v1 = vmul.f32 -1.442695, %v923_v29 }
 0x937   : > { %v1010_v34 = vpop.f32.mrb[12].mxu1 }
 0x938   : > { %v1016_v35 = vadd.f32 %v1010_v34, %v970_v31  ;;  %v1340_v36 = vpop.f32.mrb[13].mxu1 }
 0x939   : > { %v1013_v38 = vpop.f32.mrb[14].mxu1 }
 0x93a   : > { %1412 = vtanh.f32 %v1016_v35  ;;  %v1341_v39 = vpop.f32.mrb[15].mxu1  ;;  %v1251_v43 = vmul.f32 -1.442695, %v1016_v35 }
 0x93b   : > { %1414 = vpow2.f32 %v1247_v1 }
 0x93c   : > { %1416 = vpow2.f32 %v1251_v43 }
 0x940   : > { %v1411_v41 = vpop.eup %1410 }
 0x941   : > { %933 = vrot.lane.b32.xlu0 %v1411_v41, %s1437_s14 }
 0x944   : > { %v1413_v42 = vpop.eup %1412 }
 0x945   : > { %1026 = vrot.lane.b32.xlu1 %v1413_v42, %s1437_s14  ;;  %v1415_v44 = vpop.eup %1414 }
 0x946   : > { %v927_v45 = vadd.f32 1.0, %v1415_v44  ;;  %v1417_v46 = vpop.eup %1416 }
 0x947   : > { %v1020_v47 = vadd.f32 1.0, %v1417_v46 }
 0x948   : > { %1418 = vrcp.f32 %v927_v45 }
 0x949   : > { %1420 = vrcp.f32 %v1020_v47 }
 0x952   : > { %v1419_v48 = vpop.eup %1418 }
 0x953   : > { %v1421_v3 = vpop.eup %1420  ;;  %v931_v53 = vmul.f32 %v1419_v48, %v753_v11  ;;  %v493_v11 = vrot.slane %v486_v7, %v369_v63 }
 0x954   : > { %v1024_v58 = vmul.f32 %v1421_v3, %v1625_v14  ;;  %v1440_v14 = vmov 1983009808  }
 0x955   : > { %v1063_v52 = vunpack.c.l.s4 %v1440_v14 }
 0x957   : > { %v1064_v37 = vunpack.c.0.s8 %v1063_v52 }
 0x959   : > { %v1067_v40 = vsub.s32 %v1064_v37, %v368_v60 }
 0x9b3   : > { %v934_v49 = vpop.permute.xlu0 %933 }
 0x9b4   : > { %v936_v50 = vmul.f32 %v1419_v48, %v934_v49 }
 0x9b6   : > { %938 = vrot.lane.b32.xlu0 %v936_v50, %s1437_s14 }
 0x9b7   : > { %v1027_v51 = vpop.permute.xlu1 %1026 }
 0x9b8   : > { %v1029_v4 = vmul.f32 %v1421_v3, %v1027_v51 }
 0x9ba   : > { %1031 = vrot.lane.b32.xlu1 %v1029_v4, %s1437_s14 }
 0xa28   : > { %v939_v5 = vpop.permute.xlu0 %938 }
 0xa29   : > { %v941_v57 = vadd.f32 %v939_v5, %v931_v53 }
 0xa2b   : > { %1422 = vtanh.f32 %v941_v57  ;;  %v1081_v19 = vrot.slane %v941_v57, %v1067_v40 }
 0xa2c   : > { %v1032_v61 = vpop.permute.xlu1 %1031 }
 0xa2d   : > { %v1034_v62 = vadd.f32 %v1032_v61, %v1024_v58 }
 0xa2f   : > { %1424 = vtanh.f32 %v1034_v62  ;;  %v1105_v38 = vrot.slane %v1034_v62, %v1067_v40 }
 0xa35   : > { %v1423_v6 = vpop.eup %1422 }
 0xa36   : > { %944 = vrot.lane.b32.xlu0 %v1423_v6, %s1437_s14 }
 0xa39   : > { %v1425_v10 = vpop.eup %1424 }
 0xa3a   : > { %1037 = vrot.lane.b32.xlu1 %v1425_v10, %s1437_s14  ;;  %378 = vrot.lane.b32.xlu0 %v377_v9, %s1438_s16 }
 0xa3e   : > { %494 = vrot.lane.b32.xlu1 %v493_v11, %s1438_s16  ;;  %588 = vrot.lane.b32.xlu0 %v587_v15, %s1438_s16 }
 0xa42   : > { %682 = vrot.lane.b32.xlu1 %v681_v16, %s1438_s16  ;;  %776 = vrot.lane.b32.xlu0 %v775_v17, %s1438_s16 }
 0xa46   : > { %870 = vrot.lane.b32.xlu1 %v869_v18, %s1438_s16 }
 0xa4a   : > { %1082 = vrot.lane.b32.xlu1 %v1081_v19, %s1441_s17 }
 0xaa8   : > { %v945_v20 = vpop.permute.xlu0 %944 }
 0xaa9   : > { %v947_v21 = vmul.f32 %v1419_v48, %v945_v20 }
 0xaab   : > { %v948_v22 = vpack.c.bf16 %v947_v21, %v947_v21  ;;  %v1068_v23 = vrot.slane %v947_v21, %v1067_v40 }
 0xaac   : > { %v1038_v24 = vpop.permute.xlu1 %1037  ;;  %v379_v25 = vpop.permute.xlu0 %378 }
 0xaad   : > { %v956_v26 = vrot.slane %v948_v22, %v369_v63  ;;  %v1040_v27 = vmul.f32 %v1421_v3, %v1038_v24  ;;  %382 = vst.msk [vmem:[%s1483_s25] sm:$0x1] %vm381_vm3, %v379_v25  ;;  %1069 = vrot.lane.b32.xlu0 %v1068_v23, %s1438_s16 }
 0xaaf   : > { %v1041_v28 = vpack.c.bf16 %v1040_v27, %v1040_v27  ;;  %v963_v29 = vrot.slane %v956_v26, %v369_v63  ;;  %v1093_v33 = vrot.slane %v1040_v27, %v1067_v40 }
 0xab0   : > { %v495_v30 = vpop.permute.xlu1 %494  ;;  %v589_v31 = vpop.permute.xlu0 %588 }
 0xab1   : > { %v1049_v32 = vrot.slane %v1041_v28, %v369_v63  ;;  %1228 = vst.msk [vmem:[%s1493_s5 + $0x3] sm:$0x1] %vm381_vm3, %v495_v30  ;;  %1232 = vst.msk [vmem:[%s1483_s25 + $0x1] sm:$0x1] %vm381_vm3, %v589_v31  ;;  %964 = vrot.lane.b32.xlu0 %v963_v29, %s1438_s16 }
 0xab3   : > { %v1056_v34 = vrot.slane %v1049_v32, %v369_v63 }
 0xab4   : > { %v683_v35 = vpop.permute.xlu1 %682  ;;  %v777_v36 = vpop.permute.xlu0 %776 }
 0xab5   : > { %1236 = vst.msk [vmem:[%s1493_s5 + $0x2] sm:$0x1] %vm381_vm3, %v683_v35  ;;  %1240 = vst.msk [vmem:[%s1483_s25 + $0x2] sm:$0x1] %vm381_vm3, %v777_v36  ;;  %1057 = vrot.lane.b32.xlu1 %v1056_v34, %s1438_s16  ;;  %1094 = vrot.lane.b32.xlu0 %v1093_v33, %s1438_s16 }
 0xab8   : > { %v871_v39 = vpop.permute.xlu1 %870 }
 0xab9   : > { %1244 = vst.msk [vmem:[%s1493_s5 + $0x1] sm:$0x1] %vm381_vm3, %v871_v39  ;;  %1106 = vrot.lane.b32.xlu1 %v1105_v38, %s1441_s17 }
 0xabc   : > { %v1083_v41 = vpop.permute.xlu1 %1082 }
 0xabd   : > { %1085 = vst.msk [vmem:[#allocation3] sm:$0x3] %vm1072_vm4, %v1083_v41 }
 0xb1f   : > { %v1070_v42 = vpop.permute.xlu0 %1069 }
 0xb20   : > { %1073 = vst.msk [vmem:[#allocation2] sm:$0x3] %vm1072_vm4, %v1070_v42 }
 0xb23   : > { %v965_v1 = vpop.permute.xlu0 %964 }
 0xb24   : > { %1248 = vst.msk [vmem:[%s1483_s25 + $0x3] sm:$0x1] %vm381_vm3, %v965_v1 }
 0xb27   : > { %v1058_v43 = vpop.permute.xlu1 %1057  ;;  %v1095_v44 = vpop.permute.xlu0 %1094 }
 0xb28   : > { %1060 = vst.msk [vmem:[%s1493_s5] sm:$0x1] %vm381_vm3, %v1058_v43 }
 0xb29   : > { %1097 = vst.msk [vmem:[#allocation2 + $0x2] sm:$0x3] %vm1072_vm4, %v1095_v44 }
 0xb2b   : > { %v1107_v45 = vpop.permute.xlu1 %1106 }
 0xb2c   : > { %1109 = vst.msk [vmem:[#allocation3 + $0x2] sm:$0x3] %vm1072_vm4, %v1107_v45 }
 0xb2d PF: > { %s15_s15 = sadd.s32 1, %s1432_s15  }
 0xb2e   : > { %p12_p6 = scmp.ge.s32.totalorder %s15_s15, 5  }
 0xb30   :  { %14 = sbr.rel (!%p12_p6) target bundleno = 1 (0x1), region = 96 }

</bundles_post_ra>
